<compile_context>
chip_gen: v7x
topology: tpu7x:2x2x1
jax: 0.10.0
libtpu: 0.0.40
codegen_flags: <defaults>
</compile_context>

<pallas_src>
import jax
import jax.numpy as jnp
from jax.experimental import pallas as pl
from jax.experimental.pallas import tpu as pltpu

EPS = 1e-5
_LANE = 128
_SUBLANE = 8


def _make_layernorm_kernel(emb_real: int, emb_padded: int):
    """Kernel over a (row_tile, emb_padded) tile; stats over the first emb_real cols."""
    needs_mask = emb_padded != emb_real

    def kernel(x_ref, scale_ref, shift_ref, o_ref):
        x = x_ref[...].astype(jnp.float32)
        if needs_mask:
            # Masked two-pass mean/var over the real columns only (padded
            # columns must not contribute, esp. to (x - mean)^2).
            col = jax.lax.broadcasted_iota(jnp.int32, x.shape, dimension=1)
            valid = col < emb_real
            xv = jnp.where(valid, x, 0.0)
            mean = jnp.sum(xv, axis=-1, keepdims=True) * (1.0 / emb_real)
            centered = jnp.where(valid, x - mean, 0.0)
            var = jnp.sum(centered * centered, axis=-1, keepdims=True) * (1.0 / emb_real)
        else:
            mean = jnp.mean(x, axis=-1, keepdims=True)
            centered = x - mean
            # unbiased=False variance (divide by N), matching torch.var(..., unbiased=False)
            var = jnp.mean(centered * centered, axis=-1, keepdims=True)
        norm = (x - mean) * jax.lax.rsqrt(var + EPS)
        scale = scale_ref[...].astype(jnp.float32)
        shift = shift_ref[...].astype(jnp.float32)
        o_ref[...] = (scale * norm + shift).astype(o_ref.dtype)

    return kernel


def _vmem_capacity_bytes() -> int:
    try:
        return int(pltpu.get_tpu_info().vmem_capacity_bytes)
    except Exception:
        return 64 * 1024 * 1024  # conservative: v7x per-TensorCore VMEM


def _round_down_mult(x: int, m: int) -> int:
    return max(m, (x // m) * m)


def _pick_row_tile(rows: int, emb_padded: int, dtype_bytes: int, vmem_bytes: int) -> int:
    # Per-row VMEM footprint: double-buffered input + output tiles at the I/O
    # dtype plus ~3 f32 temporaries inside the body.
    per_row = emb_padded * (4 * dtype_bytes + 3 * 4)
    budget = int(vmem_bytes * 0.4)  # headroom for params / compiler scratch
    cap = max(_SUBLANE, budget // max(per_row, 1))
    cap = _round_down_mult(min(cap, 1024, max(rows, _SUBLANE)), _SUBLANE)
    # Keep >= ~4 grid steps so dimension_semantics=("parallel",) can split the
    # grid across TensorCores (v7x has 2 TCs/chip) and stay pipelined.
    while cap > _SUBLANE and pl.cdiv(rows, cap) < 4:
        cap = _round_down_mult(cap // 2, _SUBLANE)
    # Prefer an exact divisor of rows near the cap so no row padding is needed.
    for t in range(cap, max(_SUBLANE, cap // 2) - 1, -_SUBLANE):
        if rows % t == 0:
            return t
    return cap


def layer_norm(x, scale, shift, *, row_tile=None):
    """LayerNorm over the last axis of x. scale/shift have shape (emb,)."""
    orig_shape = x.shape
    emb = orig_shape[-1]
    rows = 1
    for d in orig_shape[:-1]:
        rows *= d
    x2d = x.reshape(rows, emb)

    # Lane-dense layout: pad emb up to a multiple of 128 (unmasked vst, full
    # vreg/DMA utilization). Stats are masked to the real emb inside the kernel.
    emb_padded = pl.cdiv(emb, _LANE) * _LANE
    dtype_bytes = jnp.dtype(x.dtype).itemsize
    vmem_bytes = _vmem_capacity_bytes()

    if row_tile is None:
        row_tile = _pick_row_tile(rows, emb_padded, dtype_bytes, vmem_bytes)
    row_tile = max(_SUBLANE, (int(row_tile) // _SUBLANE) * _SUBLANE)

    grid_rows = pl.cdiv(rows, row_tile)
    rows_padded = grid_rows * row_tile

    if emb_padded != emb or rows_padded != rows:
        x2d = jnp.pad(x2d, ((0, rows_padded - rows), (0, emb_padded - emb)))
    scale2d = jnp.pad(scale.reshape(1, emb), ((0, 0), (0, emb_padded - emb)))
    shift2d = jnp.pad(shift.reshape(1, emb), ((0, 0), (0, emb_padded - emb)))

    # Scoped-VMEM budget: 2x double-buffered in + out tiles, f32 temps, params,
    # plus slack. Clamped well under physical VMEM (64 MiB on v7x).
    tile_io = row_tile * emb_padded * dtype_bytes
    tile_f32 = row_tile * emb_padded * 4
    needed = 4 * tile_io + 3 * tile_f32 + 4 * emb_padded * 4 + (4 << 20)
    vmem_limit = int(min(max(needed, 32 << 20), int(vmem_bytes * 0.9)))

    # TODO(synk): for huge emb (>=32k f32 on v7x) add a second "arbitrary" grid
    # axis over emb with sum/sum-of-squares VMEM accumulators instead of one
    # full-row block.
    out = pl.pallas_call(
        _make_layernorm_kernel(emb, emb_padded),
        out_shape=jax.ShapeDtypeStruct((rows_padded, emb_padded), x.dtype),
        grid_spec=pltpu.PrefetchScalarGridSpec(
            num_scalar_prefetch=0,
            grid=(grid_rows,),
            in_specs=[
                pl.BlockSpec((row_tile, emb_padded), lambda i: (i, 0)),
                pl.BlockSpec((1, emb_padded), lambda i: (0, 0)),
                pl.BlockSpec((1, emb_padded), lambda i: (0, 0)),
            ],
            out_specs=pl.BlockSpec((row_tile, emb_padded), lambda i: (i, 0)),
        ),
        compiler_params=pltpu.CompilerParams(
            dimension_semantics=("parallel",),
            vmem_limit_bytes=vmem_limit,
        ),
    )(x2d, scale2d, shift2d)

    if emb_padded != emb or rows_padded != rows:
        out = out[:rows, :emb]
    return out.reshape(orig_shape)


def _reference(x, scale, shift):
    mean = jnp.mean(x, axis=-1, keepdims=True)
    var = jnp.mean((x - mean) ** 2, axis=-1, keepdims=True)
    return scale * ((x - mean) / jnp.sqrt(var + EPS)) + shift


if __name__ == "__main__":
    key = jax.random.PRNGKey(0)

    # Case 1: module-sized demo (emb=32 -> exercises lane-padding + masked stats).
    batch, seq, emb = 2, 8, 32
    scale = jnp.ones((emb,), dtype=jnp.float32)
    shift = jnp.zeros((emb,), dtype=jnp.float32)
    x = jax.random.normal(key, (batch, seq, emb), dtype=jnp.float32)

    out = jax.block_until_ready(layer_norm(x, scale, shift))
    assert out.shape == x.shape
    assert jnp.allclose(out, _reference(x, scale, shift), atol=1e-5, rtol=1e-5)

    # Case 2: lane-aligned emb (no padding path, divisor-based row tiling).
    k2 = jax.random.PRNGKey(1)
    b2, s2, e2 = 4, 64, 256
    scale2 = jnp.ones((e2,), dtype=jnp.float32)
    shift2 = jnp.zeros((e2,), dtype=jnp.float32)
    x2 = jax.random.normal(k2, (b2, s2, e2), dtype=jnp.float32)

    out2 = jax.block_until_ready(layer_norm(x2, scale2, shift2))
    assert out2.shape == x2.shape
    assert jnp.allclose(out2, _reference(x2, scale2, shift2), atol=1e-5, rtol=1e-5)

    print("KERNEL_OK")
</pallas_src>

<mosaic_0001>
module attributes {stable_mosaic.version = 11 : i64} {
  func.func @kernel(%arg0: i32, %arg1: memref<8x128xf32, #tpu.memory_space<vmem>>, %arg2: memref<1x128xf32, #tpu.memory_space<vmem>>, %arg3: memref<1x128xf32, #tpu.memory_space<vmem>>, %arg4: memref<8x128xf32, #tpu.memory_space<vmem>>) attributes {dimension_semantics = [#tpu.dimension_semantics<parallel>], iteration_bounds = array<i64: 2>, scalar_prefetch = 0 : i64, scratch_operands = 0 : i64, tpu.core_type = #tpu.core_type<tc>, window_params = [{transform_indices = @transform_0, window_bounds = array<i64: 8, 128>}, {pipeline_mode = #tpu.pipeline_mode<synchronous>, transform_indices = @transform_1, window_bounds = array<i64: 1, 128>}, {pipeline_mode = #tpu.pipeline_mode<synchronous>, transform_indices = @transform_2, window_bounds = array<i64: 1, 128>}, {transform_indices = @transform_3, window_bounds = array<i64: 8, 128>}]} {
    %c0 = arith.constant 0 : index
    %c0_0 = arith.constant 0 : index
    %0 = vector.load %arg1[%c0, %c0_0] : memref<8x128xf32, #tpu.memory_space<vmem>>, vector<8x128xf32>
    %1 = tpu.iota {dimensions = array<i32: 1>} : vector<8x128xi32>
    %c32_i32 = arith.constant 32 : i32
    %2 = vector.broadcast %c32_i32 : i32 to vector<8x128xi32>
    %3 = arith.cmpi slt, %1, %2 : vector<8x128xi32>
    %cst = arith.constant 0.000000e+00 : f32
    %4 = vector.broadcast %cst : f32 to vector<8x128xf32>
    %5 = arith.select %3, %0, %4 : vector<8x128xi1>, vector<8x128xf32>
    %cst_1 = arith.constant dense<0.000000e+00> : vector<8xf32>
    %6 = vector.multi_reduction <add>, %5, %cst_1 [1] : vector<8x128xf32> to vector<8xf32>
    %7 = vector.shape_cast %6 : vector<8xf32> to vector<8x1xf32>
    %cst_2 = arith.constant 3.125000e-02 : f32
    %8 = vector.broadcast %cst_2 : f32 to vector<8x1xf32>
    %9 = arith.mulf %7, %8 : vector<8x1xf32>
    %10 = vector.broadcast %9 : vector<8x1xf32> to vector<8x128xf32>
    %11 = arith.subf %0, %10 : vector<8x128xf32>
    %cst_3 = arith.constant 0.000000e+00 : f32
    %12 = vector.broadcast %cst_3 : f32 to vector<8x128xf32>
    %13 = arith.select %3, %11, %12 : vector<8x128xi1>, vector<8x128xf32>
    %14 = arith.mulf %13, %13 : vector<8x128xf32>
    %cst_4 = arith.constant dense<0.000000e+00> : vector<8xf32>
    %15 = vector.multi_reduction <add>, %14, %cst_4 [1] : vector<8x128xf32> to vector<8xf32>
    %16 = vector.shape_cast %15 : vector<8xf32> to vector<8x1xf32>
    %cst_5 = arith.constant 3.125000e-02 : f32
    %17 = vector.broadcast %cst_5 : f32 to vector<8x1xf32>
    %18 = arith.mulf %16, %17 : vector<8x1xf32>
    %19 = vector.broadcast %9 : vector<8x1xf32> to vector<8x128xf32>
    %20 = arith.subf %0, %19 : vector<8x128xf32>
    %cst_6 = arith.constant 9.99999974E-6 : f32
    %21 = vector.broadcast %cst_6 : f32 to vector<8x1xf32>
    %22 = arith.addf %18, %21 : vector<8x1xf32>
    %23 = math.rsqrt %22 : vector<8x1xf32>
    %24 = vector.broadcast %23 : vector<8x1xf32> to vector<8x128xf32>
    %25 = arith.mulf %20, %24 : vector<8x128xf32>
    %c0_7 = arith.constant 0 : index
    %c0_8 = arith.constant 0 : index
    %26 = vector.load %arg2[%c0_7, %c0_8] : memref<1x128xf32, #tpu.memory_space<vmem>>, vector<1x128xf32>
    %c0_9 = arith.constant 0 : index
    %c0_10 = arith.constant 0 : index
    %27 = vector.load %arg3[%c0_9, %c0_10] : memref<1x128xf32, #tpu.memory_space<vmem>>, vector<1x128xf32>
    %28 = vector.broadcast %26 : vector<1x128xf32> to vector<8x128xf32>
    %29 = arith.mulf %28, %25 : vector<8x128xf32>
    %30 = vector.broadcast %27 : vector<1x128xf32> to vector<8x128xf32>
    %31 = arith.addf %29, %30 : vector<8x128xf32>
    %c0_11 = arith.constant 0 : index
    %c0_12 = arith.constant 0 : index
    %32 = vector.load %arg4[%c0_11, %c0_12] : memref<8x128xf32, #tpu.memory_space<vmem>>, vector<8x128xf32>
    tpu.vector_store %arg4[%c0_11, %c0_12], %31 {strides = array<i32>} : memref<8x128xf32, #tpu.memory_space<vmem>>, vector<8x128xf32>,
    return
  }
  func.func @transform_0(%arg0: i32) -> (i32, i32) {
    %c0_i32 = arith.constant 0 : i32
    %c0_i32_0 = arith.constant 0 : i32
    return %arg0, %c0_i32 : i32, i32
  }
  func.func @transform_1(%arg0: i32) -> (i32, i32) {
    %c0_i32 = arith.constant 0 : i32
    %c0_i32_0 = arith.constant 0 : i32
    %c0_i32_1 = arith.constant 0 : i32
    return %c0_i32, %c0_i32_0 : i32, i32
  }
  func.func @transform_2(%arg0: i32) -> (i32, i32) {
    %c0_i32 = arith.constant 0 : i32
    %c0_i32_0 = arith.constant 0 : i32
    %c0_i32_1 = arith.constant 0 : i32
    return %c0_i32, %c0_i32_0 : i32, i32
  }
  func.func @transform_3(%arg0: i32) -> (i32, i32) {
    %c0_i32 = arith.constant 0 : i32
    %c0_i32_0 = arith.constant 0 : i32
    return %arg0, %c0_i32 : i32, i32
  }
}

</mosaic_0001>

<bundles_post_ra>
// kernel: tpu_custom_call.1
= control target key start
LH: loop header
LB: loop body
LE: loop exit
PB: predicated region body
PF: predicated region fallthrough
CT: control target
= control target key end

     0   :  { %8 = vsyncpa [#allocation3], 0  ;;  %s653_s0 = inlined_call_operand.hbm [shape: f32[16,128], index: 0, kind: input, shape index: {}]   ;;  %s654_s1 = inlined_call_operand.vmem [shape: f32[1,128], index: 1, kind: input, shape index: {}]   ;;  %s655_s2 = inlined_call_operand.vmem [shape: f32[1,128], index: 2, kind: input, shape index: {}]   ;;  %s656_s3 = inlined_call_operand.hbm [shape: f32[16,128], index: 3, kind: output, shape index: {}]  }
   0x1   :  { %10 = vsyncpa [#allocation3 + $0x1], 0 }
   0x2   :  { %11 = vsyncpa [#allocation4], 0 }
   0x3   :  { %13 = vsyncpa [#allocation4 + $0x1], 0  ;;  %s486_s12 = smov 0   ;;  %s488_s13 = smov 0  }
   0x4   :  { %s490_s14 = smov 0   ;;  %s492_s15 = smov 0  }
   0x5 LB: > { %s507_s16 = sadd.s32 4294967295, %s462_s15   ;;  %s304_s17 = sadd.s32 4294967294, %s462_s15   ;;  %s462_s15 = sphi %s492_s15, %s671_s15   ;;  %s458_s14 = sphi %s490_s14, %s670_s14   ;;  %s454_s13 = sphi %s488_s13, %s669_s13   ;;  %s450_s12 = sphi %s486_s12, %s668_s12  }
   0x6   : > { %s511_s18 = sadd.s32 1, %s462_s15   ;;  %s26_s19 = sadd.s32 1, %s458_s14 }
   0x7   : > { %s23_s20 = ssub.s32 %s462_s15, %s511_s18  ;;  %p33_p0 = scmp.ne.s32.totalorder %s458_s14, %s454_s13 }
   0x8   : > { %p24_p1 = scmp.eq.s32.totalorder %s23_s20, 0  ;;  %p34_p2 = scmp.eq.s32.totalorder %s462_s15, 0 }
   0x9   : > { %p39_p3 = scmp.ne.s32.totalorder %s454_s13, %s450_s12  ;;  %p40_p4 = scmp.eq.s32.totalorder %s507_s16, 0 }
   0xa   : > { %s523_s21 = scalar_select %p24_p1, %s458_s14, %s26_s19  }
   0xb   : > { %p525_p5 = por %p34_p2, %p33_p0  ;;  %p529_p6 = por %p40_p4, %p39_p3 }
   0xc   : > { %p105_p7 = scmp.eq.s32.totalorder %s507_s16, 1  ;;  %p111_p8 = scmp.eq.s32.totalorder %s304_s17, 1 }
   0xd   : > { %p330_p10 = scmp.lt.s32.totalorder %s462_s15, 2  ;;  %s137_s26 = sand.u32 1, %s458_s14  }
   0xe   : > { %p536_p11 = por %p105_p7, %p33_p0  ;;  %p540_p12 = por %p111_p8, %p39_p3 }
   0xf   : > { %s308_s27 = sshll.u32 %s462_s15, 7  ;;  %s307_s28 = sshll.u32 %s137_s26, 3 }
  0x10   : > { %s660_s24 = scalar_select %p536_p11, 1, 0 }
  0x11   : > { %s661_s25 = scalar_select %p540_p12, 1, 0 }
  0x12   : > { %s549_s4 = scalar_lea.hbm %s653_s0, %s308_s27  ;;  %s141_s5 = scalar_lea.vmem [#allocation2], %s307_s28 }
  0x13   : > { %s148_s6 = sshll.u32 %s141_s5, 4  ;;  %p553_p13 = pnand %p330_p10, %p525_p5  ;;  %s557_s6 = int_to_ptr.vmem [resolvable:$true] %s148_s6 }
  0x14   : > { %s138_s8 = scalar_lea.sflag [#allocation3], %s137_s26  ;;  %s366_s9 = scalar_lea.hbm %s549_s4, 128 }
  0x15   : > { %p367_p2 = scmp.ne.s32.totalorder %s549_s4, %s366_s9  ;;  %p368_p3 = pneg %p553_p13 }
  0x16   : > { %s371_s17 = scalar_lea.hbm %s653_s0, 256  ;;  %p372_p5 = scmp.lt.u32.totalorder %s549_s4, %s653_s0 }
  0x17   : > { %p369_p4 = pnand %p368_p3, %p367_p2  ;;  %p373_p8 = scmp.lt.u32.totalorder %s371_s17, %s366_s9 }
  0x18   : > { %p375_p9 = scmp.lt.u32.totalorder %s366_s9, %s549_s4 }
  0x19   : > { %p370_p7 = pneg %p369_p4  ;;  %p374_p10 = por %p373_p8, %p372_p5 }
  0x1b   : > { %p376_p0 = por %p375_p9, %p374_p10 }
  0x1d   : > { %p377_p1 = pnand %p376_p0, %p370_p7 }
  0x1f   : > { %380 = shalt.err (!%p377_p1)
}
  0x20   : > { %s381_s22 = scalar_lea.vmem %s557_s6, 128  ;;  %s464_s26 = smov [#allocation2]  }
  0x21   : > { %p382_p2 = scmp.ne.s32.totalorder %s557_s6, %s381_s22  ;;  %s386_s27 = sshll.u32 %s464_s26, 4  ;;  %s387_s27 = int_to_ptr.vmem [resolvable:$false] %s386_s27 }
  0x22   : > { %s388_s28 = scalar_lea.vmem %s387_s27, 256  ;;  %p389_p11 = scmp.lt.s32.totalorder %s557_s6, %s387_s27 }
  0x23   : > { %p384_p4 = pnand %p382_p2, %p368_p3  ;;  %p390_p5 = scmp.lt.s32.totalorder %s388_s28, %s381_s22 }
  0x25   : > { %p385_p12 = pneg %p384_p4  ;;  %p391_p8 = por %p390_p5, %p389_p11 }
  0x27   : > { %p392_p9 = pnand %p391_p8, %p385_p12 }
  0x29   : > { %395 = shalt.err (!%p392_p9)
}
  0x2a   : > { %325 = dma.hbm_to_vmem [thread:$0]  (!%p553_p13), %s549_s4, 128, %s557_s6, %s138_s8  }
  0x2b   : > { %p663_p0 = scmp.lt.s32.totalorder %s462_s15, 3  ;;  %p664_p1 = scmp.ge.s32.totalorder %s462_s15, 1 }
  0x2d   : > { %p154_p3 = pnand %p664_p1, %p663_p0 }
  0x2e   : > { %s591_s29 = sand.u32 (!%p154_p3), 1, %s454_s13  }
  0x2f   : > { %157 = sbr.rel (%p154_p3) target bundleno = 387 (0x183), region = 32  ;;  %s310_s30 = sshll.u32 (!%p154_p3), %s591_s29, 3 }
  0x30   : > { %s160_s5 = scalar_lea.sflag (!%p154_p3), [#allocation3], %s591_s29  ;;  %s163_s9 = scalar_lea.vmem (!%p154_p3), [#allocation2], %s310_s30 }
  0x36   : > { %441 = dma.done.wait (%p529_p6), %s160_s5, 128  }
  0x37   : > { %443 = vsyncadd (%p529_p6), %s160_s5, 4294967168  ;;  %v187_v0 = vlaneseq  ;;  %v186_v2 = vld [vmem:[%s163_s9] sm:$0xff]  ;;  %s315_s8 = sshll.u32 %s507_s16, 7  ;;  %s185_s10 = scalar_lea.vmem [#allocation5], %s310_s30 }
  0x38   : > { %v312_v13 = vld [vmem:[%s654_s1] ss:$0 sm:$0xff]  ;;  %s234_s11 = sshll.u32 %s185_s10, 4  ;;  %s609_s20 = scalar_lea.hbm %s656_s3, %s315_s8  ;;  %s611_s11 = int_to_ptr.vmem [resolvable:$true] %s234_s11 }
  0x39   : > { %v188_v1 = vand.u32 127, %v187_v0  ;;  %v313_v15 = vld [vmem:[%s655_s2] ss:$0 sm:$0xff]  ;;  %s221_s22 = scalar_lea.sflag [#allocation4], %s591_s29  ;;  %s396_s26 = scalar_lea.vmem %s611_s11, 128 }
  0x3a   : > { %p397_p6 = scmp.ne.s32.totalorder %s611_s11, %s396_s26  ;;  %p665_p11 = scmp.ne.s32.totalorder %s660_s24, 0 }
  0x3b   : > { %vm189_vm0 = vcmp.lt.s32.totalorder %v188_v1, 32  ;;  %s465_s16 = smov [#allocation5]  }
  0x3c   : > { %v190_v3 = vsel %vm189_vm0, %v186_v2, 0.0  ;;  %p398_p12 = pnand %p397_p6, %p665_p11  ;;  %s400_s27 = sshll.u32 %s465_s16, 4  ;;  %s401_s27 = int_to_ptr.vmem [resolvable:$false] %s400_s27 }
  0x3d   : > { %191 = vadd.xlane.f32.xlu0 %v190_v3  ;;  %s402_s28 = scalar_lea.vmem %s401_s27, 256  ;;  %p403_p7 = scmp.lt.s32.totalorder %s611_s11, %s401_s27 }
  0x3e   : > { %p399_p13 = pneg %p398_p12  ;;  %p404_p10 = scmp.lt.s32.totalorder %s402_s28, %s396_s26 }
  0x40   : > { %p405_p2 = por %p404_p10, %p403_p7 }
  0x42   : > { %p406_p4 = pnand %p405_p2, %p399_p13 }
  0xca   : > { %v192_v4 = vpop.xlane.xlu0 %191 }
  0xcb   : > { %v193_v5 = vmul.f32 0.03125, %v192_v4 }
  0xcd   : > { %v194_v6 = vsub.f32 %v186_v2, %v193_v5 }
  0xcf   : > { %v195_v7 = vsel %vm189_vm0, %v194_v6, 0.0 }
  0xd0   : > { %v196_v8 = vmul.f32 %v195_v7, %v195_v7 }
  0xd2   : > { %197 = vadd.xlane.f32.xlu0 %v196_v8 }
 0x15f   : > { %v198_v9 = vpop.xlane.xlu0 %197 }
 0x160   : > { %v199_v10 = vmul.f32 0.03125, %v198_v9 }
 0x162   : > { %v200_v11 = vadd.f32 1e-05, %v199_v10 }
 0x164   : > { %364 = vrsqrt.f32 %v200_v11 }
 0x16e   : > { %v365_v12 = vpop.eup %364 }
 0x16f   : > { %v202_v14 = vmul.f32 %v365_v12, %v194_v6 }
 0x171   : > { %v211_v16 = vmul.f32 %v312_v13, %v202_v14 }
 0x173   : > { %v218_v17 = vadd.f32 %v313_v15, %v211_v16 }
 0x175   : > { %219 = vst [vmem:[%s185_s10] sm:$0xff] %v218_v17 }
 0x176   : > { %409 = shalt.err (!%p406_p4)
}
 0x177   : > { %s410_s29 = scalar_lea.hbm %s609_s20, 128  ;;  %s414_s9 = scalar_lea.hbm %s656_s3, 256 }
 0x178   : > { %p411_p5 = scmp.ne.s32.totalorder %s609_s20, %s410_s29  ;;  %p415_p0 = scmp.lt.u32.totalorder %s609_s20, %s656_s3 }
 0x179   : > { %p416_p1 = scmp.lt.u32.totalorder %s414_s9, %s410_s29  ;;  %p418_p6 = scmp.lt.u32.totalorder %s410_s29, %s609_s20 }
 0x17a   : > { %p412_p8 = pnand %p411_p5, %p665_p11 }
 0x17b   : > { %p417_p3 = por %p416_p1, %p415_p0 }
 0x17c   : > { %p413_p9 = pneg %p412_p8 }
 0x17d   : > { %p419_p12 = por %p418_p6, %p417_p3 }
 0x17f   : > { %p420_p13 = pnand %p419_p12, %p413_p9 }
 0x181   : > { %423 = shalt.err (!%p420_p13)
}
 0x182   : > { %320 = dma.vmem_to_hbm [thread:$0]  (%p665_p11), %s611_s11, 128, %s609_s20, %s221_s22  }
 0x183 PF: > { %s246_s6 = sand.u32 1, %s450_s12   ;;  %p666_p7 = scmp.ne.s32.totalorder %s661_s25, 0 }
 0x184   : > { %p667_p10 = scmp.ge.s32.totalorder %s462_s15, 2  ;;  %s247_s7 = scalar_lea.sflag [#allocation4], %s246_s6 }
 0x186   : > { %p327_p2 = pnand %p667_p10, %p666_p7 }
 0x188   : > { %445 = dma.done.wait (!%p327_p2), %s247_s7, 128  }
 0x189   : > { %447 = vsyncadd (!%p327_p2), %s247_s7, 4294967168  ;;  %p16_p4 = scmp.ge.s32.totalorder %s511_s18, 4   ;;  %s668_s12 = smov %s454_s13 }
 0x18a   : > { %s669_s13 = smov %s458_s14  ;;  %s670_s14 = smov %s523_s21 }
 0x18b   : > { %s671_s15 = smov %s511_s18  ;;  %18 = sbr.rel (!%p16_p4) target bundleno = 5 (0x5), region = 77 }
 0x192   :  { %252 = vsyncpa [#allocation3], 1 }
 0x193   :  { %254 = vsyncpa [#allocation3 + $0x1], 1 }
 0x194   :  { %255 = vsyncpa [#allocation4], 1 }
 0x195   :  { %257 = vsyncpa [#allocation4 + $0x1], 1 }

</bundles_post_ra>
